<compile_context>
chip_gen: v7x
topology: tpu7x:2x2x1
jax: 0.10.0
libtpu: 0.0.40
codegen_flags: <defaults>
</compile_context>

<pallas_src>
import functools

import jax
import jax.numpy as jnp
from jax.experimental import pallas as pl
from jax.experimental.pallas import tpu as pltpu


def _round_up(v, m):
    return ((v + m - 1) // m) * m


# ---------------------------------------------------------------------------
# Kernel 1: XW = X @ W1   (computed once, kept in bf16 for streaming)
# ---------------------------------------------------------------------------
def _xw_kernel(x_ref, w1_ref, xw_ref):
    xw_ref[...] = jnp.dot(
        x_ref[...], w1_ref[...], preferred_element_type=jnp.float32
    ).astype(xw_ref.dtype)


# ---------------------------------------------------------------------------
# Kernel 2: row-tiled  A_hat @ XW  accumulation + bias + ReLU + mean-pool
# ---------------------------------------------------------------------------
def _make_agg_kernel(tile_k, xw_resident):
    def kernel(adj_ref, xw_ref, b1_ref, pool_ref, out_ref, acc_ref):
        k = pl.program_id(1)

        @pl.when(k == 0)
        def _init():
            acc_ref[...] = jnp.zeros_like(acc_ref)

        if xw_resident:
            # XW lives fully in VMEM (constant index map); slice the k block.
            start = pl.multiple_of(k * tile_k, tile_k)
            xw_blk = xw_ref[pl.ds(start, tile_k), :]
        else:
            xw_blk = xw_ref[...]

        # MXU accumulate: (tile_m, tile_k) bf16 @ (tile_k, H_pad) bf16 -> f32
        acc_ref[...] += jnp.dot(adj_ref[...], xw_blk,
                                preferred_element_type=jnp.float32)

        @pl.when(k == pl.num_programs(1) - 1)
        def _finalize():
            # GCNConv bias (post-aggregation, PyG default) + ReLU.
            # Padded node rows give ReLU(b1) here; pool has zero columns for
            # them, so they contribute nothing to the pooled partial.
            h = jnp.maximum(acc_ref[...] + b1_ref[...], 0.0)       # (tile_m, H_pad)
            # Partial mean-pool contribution of this row tile (bf16 in, f32 acc).
            pooled = jnp.dot(pool_ref[...], h.astype(pool_ref.dtype),
                             preferred_element_type=jnp.float32)    # (G_pad, H_pad)
            out_ref[...] = pooled[None]

    return kernel


# ---------------------------------------------------------------------------
# Graph glue: padded bf16 normalized adjacency / pooling matrix (built in-jit)
# ---------------------------------------------------------------------------
def _build_adj_hat_padded(edge_index, num_nodes, n_row_pad, n_col_pad, dtype):
    """D^-1/2 (A + I) D^-1/2, written directly into the padded buffer."""
    src, dst = edge_index[0], edge_index[1]
    a = jnp.zeros((num_nodes, num_nodes), jnp.float32)
    a = a.at[dst, src].set(1.0)
    a = a.at[src, dst].set(1.0)                        # undirected
    a = a + jnp.eye(num_nodes, dtype=jnp.float32)      # self loops
    deg = jnp.sum(a, axis=1)
    d = jnp.where(deg > 0, jax.lax.rsqrt(deg), 0.0)
    a = (d[:, None] * a * d[None, :]).astype(dtype)
    return jnp.zeros((n_row_pad, n_col_pad), dtype).at[:num_nodes, :num_nodes].set(a)


def _build_pool_padded(batch, num_graphs, g_pad, n_row_pad, dtype):
    """P[g, i] = 1 / count(batch == g) if batch[i] == g else 0, padded."""
    n = batch.shape[0]
    onehot = (batch[None, :] == jnp.arange(num_graphs)[:, None]).astype(jnp.float32)
    counts = jnp.maximum(onehot.sum(axis=1, keepdims=True), 1.0)
    p = (onehot / counts).astype(dtype)
    return jnp.zeros((g_pad, n_row_pad), dtype).at[:num_graphs, :n].set(p)


def _pick_tiles(n_nodes, tile_m, tile_k):
    n128 = _round_up(n_nodes, 128)
    if tile_k is None:
        tile_k = min(1024, n128)                 # big per-step DMA
    if tile_m is None:
        tile_m = min(512, n128)
        # Prefer >= 2 row tiles so the "parallel" axis feeds both v7x cores.
        if _round_up(n_nodes, tile_m) // tile_m < 2 and tile_m > 128:
            tile_m = max(128, (n128 // 2) // 128 * 128)
    return tile_m, tile_k


# ---------------------------------------------------------------------------
# Forward: pad, build bf16 adjacency/pool, launch kernels, tiny head in XLA.
# ---------------------------------------------------------------------------
@functools.partial(
    jax.jit,
    static_argnames=("num_graphs", "tile_m", "tile_k", "vmem_limit_bytes"))
def gcn_net_forward(x, edge_index, batch, w1, b1, w2, b2, *,
                    num_graphs, tile_m=None, tile_k=None,
                    vmem_limit_bytes=None):
    n_nodes, f_in = x.shape
    hid = w1.shape[1]
    n_cls = w2.shape[1]

    h_pad = _round_up(hid, 128)
    g_pad = _round_up(num_graphs, 8)

    tile_m, tile_k = _pick_tiles(n_nodes, tile_m, tile_k)
    n_row_pad = _round_up(n_nodes, tile_m)       # rows padded to tile_m only
    n_col_pad = _round_up(n_nodes, tile_k)       # cols padded to tile_k only
    n_row_tiles = n_row_pad // tile_m
    n_k_tiles = n_col_pad // tile_k

    # XW residency: keep the whole (N_col_pad, H_pad) bf16 XW in VMEM when it
    # fits comfortably; otherwise fall back to streaming (tile_k, H_pad) blocks.
    xw_bytes = n_col_pad * h_pad * 2
    xw_resident = xw_bytes <= 8 * 1024 * 1024

    if vmem_limit_bytes is None:
        adj_buf = 2 * tile_m * tile_k * 2                       # double-buffered
        xw_buf = 2 * (xw_bytes if xw_resident else tile_k * h_pad * 2)
        pool_buf = 2 * g_pad * tile_m * 2
        acc_buf = tile_m * h_pad * 4
        out_buf = 2 * g_pad * h_pad * 4
        need = adj_buf + xw_buf + pool_buf + acc_buf + out_buf + (2 << 20)
        # Cap at 48 MiB: safe on v7x (64 MiB VMEM), ample headroom on v5e/v6e.
        vmem_limit_bytes = int(min(max(int(need * 1.25), 32 << 20), 48 << 20))

    # Zero-padding keeps the math exact: padded nodes have zero pool weight,
    # padded H columns have zero W1 columns / zero bias and are sliced off.
    x_p = jnp.zeros((n_col_pad, f_in), jnp.bfloat16).at[:n_nodes, :].set(
        x.astype(jnp.bfloat16))
    w1_p = jnp.zeros((f_in, h_pad), jnp.bfloat16).at[:, :hid].set(
        w1.astype(jnp.bfloat16))
    b1_p = jnp.zeros((1, h_pad), jnp.float32).at[:, :hid].set(
        b1.astype(jnp.float32).reshape(1, hid))
    adj_p = _build_adj_hat_padded(edge_index, n_nodes, n_row_pad, n_col_pad,
                                  jnp.bfloat16)
    pool_p = _build_pool_padded(batch, num_graphs, g_pad, n_row_pad,
                                jnp.bfloat16)

    # --- Kernel 1: XW (tiny; row-tiled, parallel, true F — no F padding) ----
    xw = pl.pallas_call(
        _xw_kernel,
        out_shape=jax.ShapeDtypeStruct((n_col_pad, h_pad), jnp.bfloat16),
        grid_spec=pltpu.PrefetchScalarGridSpec(
            num_scalar_prefetch=0,
            grid=(n_k_tiles,),
            in_specs=[
                pl.BlockSpec((tile_k, f_in), lambda i: (i, 0)),
                pl.BlockSpec((f_in, h_pad), lambda i: (0, 0)),
            ],
            out_specs=pl.BlockSpec((tile_k, h_pad), lambda i: (i, 0)),
        ),
        compiler_params=pltpu.CompilerParams(
            dimension_semantics=("parallel",),
            vmem_limit_bytes=vmem_limit_bytes),
    )(x_p, w1_p)

    # --- Kernel 2: adjacency-streaming aggregation + bias/ReLU/pool epilogue -
    if xw_resident:
        xw_spec = pl.BlockSpec((n_col_pad, h_pad), lambda i, k: (0, 0))
    else:
        xw_spec = pl.BlockSpec((tile_k, h_pad), lambda i, k: (k, 0))

    partials = pl.pallas_call(
        _make_agg_kernel(tile_k, xw_resident),
        out_shape=jax.ShapeDtypeStruct((n_row_tiles, g_pad, h_pad), jnp.float32),
        grid_spec=pltpu.PrefetchScalarGridSpec(
            num_scalar_prefetch=0,
            grid=(n_row_tiles, n_k_tiles),
            in_specs=[
                pl.BlockSpec((tile_m, tile_k), lambda i, k: (i, k)),  # adj tile
                xw_spec,                                              # XW
                pl.BlockSpec((1, h_pad), lambda i, k: (0, 0)),        # b1
                pl.BlockSpec((g_pad, tile_m), lambda i, k: (0, i)),   # pool cols
            ],
            out_specs=pl.BlockSpec((1, g_pad, h_pad), lambda i, k: (i, 0, 0)),
            scratch_shapes=[pltpu.VMEM((tile_m, h_pad), jnp.float32)],
        ),
        compiler_params=pltpu.CompilerParams(
            dimension_semantics=("parallel", "arbitrary"),
            vmem_limit_bytes=vmem_limit_bytes),
    )(adj_p, xw, b1_p, pool_p)

    # Tiny reduction over row-tile partials + Linear head in XLA (was <4% MXU
    # utilization inside the kernel epilogue).
    pooled = jnp.sum(partials, axis=0)[:num_graphs, :hid]        # (G, H) f32
    return pooled @ w2.astype(jnp.float32) + b2.astype(jnp.float32).reshape(1, n_cls)


# ---------------------------------------------------------------------------
# Pure-f32 reference helpers (for the correctness check only)
# ---------------------------------------------------------------------------
def build_adj_hat(edge_index, num_nodes):
    src, dst = edge_index[0], edge_index[1]
    a = jnp.zeros((num_nodes, num_nodes), jnp.float32)
    a = a.at[dst, src].set(1.0)
    a = a.at[src, dst].set(1.0)
    a = a + jnp.eye(num_nodes, dtype=jnp.float32)
    deg = jnp.sum(a, axis=1)
    d = jnp.where(deg > 0, 1.0 / jnp.sqrt(deg), 0.0)
    return d[:, None] * a * d[None, :]


def build_pool_matrix(batch, num_graphs):
    onehot = (batch[None, :] == jnp.arange(num_graphs)[:, None]).astype(jnp.float32)
    counts = jnp.maximum(onehot.sum(axis=1, keepdims=True), 1.0)
    return onehot / counts


# ---------------------------------------------------------------------------
# Demo / test
# ---------------------------------------------------------------------------
if __name__ == "__main__":
    key = jax.random.PRNGKey(0)
    k_x, k_w1, k_b1, k_w2, k_b2 = jax.random.split(key, 5)

    # 2 graphs x 80 nodes -> N=160: pads to 256 rows/cols, 2 row tiles of 128
    # (keeps both v7x TensorCores busy) x 1 k-tile of 256, XW fully resident.
    nodes_per_graph = 80
    G = 2
    N = nodes_per_graph * G
    F, Hid, C = 8, 16, 4                # Net(num_features=8, num_classes=4)

    x = jax.random.normal(k_x, (N, F), dtype=jnp.float32)

    # Chain edges inside each graph.
    srcs = [jnp.arange(g * nodes_per_graph, (g + 1) * nodes_per_graph - 1,
                       dtype=jnp.int32) for g in range(G)]
    src = jnp.concatenate(srcs)
    dst = src + 1
    edge_index = jnp.stack([src, dst], axis=0)        # [2, E]

    batch = jnp.repeat(jnp.arange(G, dtype=jnp.int32), nodes_per_graph)

    # Deterministic parameter init (shapes from Net.__init__).
    w1 = jax.random.normal(k_w1, (F, Hid), dtype=jnp.float32) * 0.1  # GCNConv weight
    b1 = jax.random.normal(k_b1, (1, Hid), dtype=jnp.float32) * 0.1  # GCNConv bias
    w2 = jax.random.normal(k_w2, (Hid, C), dtype=jnp.float32) * 0.1  # Linear weight
    b2 = jax.random.normal(k_b2, (1, C), dtype=jnp.float32) * 0.1    # Linear bias

    out = gcn_net_forward(x, edge_index, batch, w1, b1, w2, b2, num_graphs=G)
    out = jax.block_until_ready(out)

    # Pure-f32 JAX reference (kernel streams adjacency/XW/pool in bf16,
    # accumulates in f32 -> loosened tolerance).
    adj_hat = build_adj_hat(edge_index, N)
    pool = build_pool_matrix(batch, G)
    ref_h = jnp.maximum(adj_hat @ (x @ w1) + b1, 0.0)
    ref = pool @ ref_h @ w2 + b2

    assert out.shape == (G, C)
    assert jnp.allclose(out, ref, atol=2e-2, rtol=2e-2), (out, ref)

    print("KERNEL_OK")
</pallas_src>

<mosaic_0001>
module attributes {stable_mosaic.version = 11 : i64} {
  func.func @_xw_kernel(%arg0: i32, %arg1: memref<256x8xbf16, #tpu.memory_space<vmem>>, %arg2: memref<8x128xbf16, #tpu.memory_space<vmem>>, %arg3: memref<256x128xbf16, #tpu.memory_space<vmem>>) attributes {dimension_semantics = [#tpu.dimension_semantics<parallel>], iteration_bounds = array<i64: 1>, scalar_prefetch = 0 : i64, scratch_operands = 0 : i64, tpu.core_type = #tpu.core_type<tc>, window_params = [{transform_indices = @transform_0, window_bounds = array<i64: 256, 8>}, {pipeline_mode = #tpu.pipeline_mode<synchronous>, transform_indices = @transform_1, window_bounds = array<i64: 8, 128>}, {transform_indices = @transform_2, window_bounds = array<i64: 256, 128>}]} {
    %c0 = arith.constant 0 : index
    %c0_0 = arith.constant 0 : index
    %0 = vector.load %arg1[%c0, %c0_0] : memref<256x8xbf16, #tpu.memory_space<vmem>>, vector<256x8xbf16>
    %c0_1 = arith.constant 0 : index
    %c0_2 = arith.constant 0 : index
    %1 = vector.load %arg2[%c0_1, %c0_2] : memref<8x128xbf16, #tpu.memory_space<vmem>>, vector<8x128xbf16>
    %cst = arith.constant dense<0.000000e+00> : vector<256x128xf32>
    %2 = tpu.matmul %0, %1, %cst {dimension_numbers = #tpu.dot_dimension_numbers<[1], [0], [0], [1], [0, 0, 1, 1], [], []>} : vector<256x8xbf16>, vector<8x128xbf16>, vector<256x128xf32> -> vector<256x128xf32>
    %3 = arith.truncf %2 : vector<256x128xf32> to vector<256x128xbf16>
    %c0_3 = arith.constant 0 : index
    %c0_4 = arith.constant 0 : index
    %4 = vector.load %arg3[%c0_3, %c0_4] : memref<256x128xbf16, #tpu.memory_space<vmem>>, vector<256x128xbf16>
    tpu.vector_store %arg3[%c0_3, %c0_4], %3 {strides = array<i32>} : memref<256x128xbf16, #tpu.memory_space<vmem>>, vector<256x128xbf16>,
    return
  }
  func.func @transform_0(%arg0: i32) -> (i32, i32) {
    %c0_i32 = arith.constant 0 : i32
    %c0_i32_0 = arith.constant 0 : i32
    return %arg0, %c0_i32 : i32, i32
  }
  func.func @transform_1(%arg0: i32) -> (i32, i32) {
    %c0_i32 = arith.constant 0 : i32
    %c0_i32_0 = arith.constant 0 : i32
    %c0_i32_1 = arith.constant 0 : i32
    return %c0_i32, %c0_i32_0 : i32, i32
  }
  func.func @transform_2(%arg0: i32) -> (i32, i32) {
    %c0_i32 = arith.constant 0 : i32
    %c0_i32_0 = arith.constant 0 : i32
    return %arg0, %c0_i32 : i32, i32
  }
}

module attributes {stable_mosaic.version = 11 : i64} {
  func.func @kernel(%arg0: i32, %arg1: i32, %arg2: memref<128x256xbf16, #tpu.memory_space<vmem>>, %arg3: memref<256x128xbf16, #tpu.memory_space<vmem>>, %arg4: memref<1x128xf32, #tpu.memory_space<vmem>>, %arg5: memref<8x128xbf16, #tpu.memory_space<vmem>>, %arg6: memref<1x8x128xf32, #tpu.memory_space<vmem>>, %arg7: memref<128x128xf32, #tpu.memory_space<vmem>>) attributes {dimension_semantics = [#tpu.dimension_semantics<parallel>, #tpu.dimension_semantics<arbitrary>], iteration_bounds = array<i64: 2, 1>, scalar_prefetch = 0 : i64, scratch_operands = 1 : i64, tpu.core_type = #tpu.core_type<tc>, window_params = [{transform_indices = @transform_0, window_bounds = array<i64: 128, 256>}, {pipeline_mode = #tpu.pipeline_mode<synchronous>, transform_indices = @transform_1, window_bounds = array<i64: 256, 128>}, {pipeline_mode = #tpu.pipeline_mode<synchronous>, transform_indices = @transform_2, window_bounds = array<i64: 1, 128>}, {transform_indices = @transform_3, window_bounds = array<i64: 8, 128>}, {transform_indices = @transform_4, window_bounds = array<i64: 1, 8, 128>}]} {
    %c0_i32 = arith.constant 0 : i32
    %0 = arith.cmpi eq, %arg1, %c0_i32 : i32
    %1 = arith.extui %0 : i1 to i32
    %c0_i32_0 = arith.constant 0 : i32
    %2 = arith.cmpi ne, %1, %c0_i32_0 : i32
    scf.if %2 {
      %cst_9 = arith.constant 0.000000e+00 : f32
      %15 = vector.broadcast %cst_9 : f32 to vector<128x128xf32>
      %c0_10 = arith.constant 0 : index
      %c0_11 = arith.constant 0 : index
      %16 = vector.load %arg7[%c0_10, %c0_11] : memref<128x128xf32, #tpu.memory_space<vmem>>, vector<128x128xf32>
      tpu.vector_store %arg7[%c0_10, %c0_11], %15 {strides = array<i32>} : memref<128x128xf32, #tpu.memory_space<vmem>>, vector<128x128xf32>,
    } else {
    }
    %c256_i32 = arith.constant 256 : i32
    %3 = arith.muli %arg1, %c256_i32 : i32
    %4 = tpu.assume_multiple %3, 256 : i32
    %5 = arith.index_cast %4 : i32 to index
    %c0 = arith.constant 0 : index
    %6 = vector.load %arg3[%5, %c0] : memref<256x128xbf16, #tpu.memory_space<vmem>>, vector<256x128xbf16>
    %c0_1 = arith.constant 0 : index
    %c0_2 = arith.constant 0 : index
    %7 = vector.load %arg7[%c0_1, %c0_2] : memref<128x128xf32, #tpu.memory_space<vmem>>, vector<128x128xf32>
    %c0_3 = arith.constant 0 : index
    %c0_4 = arith.constant 0 : index
    %8 = vector.load %arg2[%c0_3, %c0_4] : memref<128x256xbf16, #tpu.memory_space<vmem>>, vector<128x256xbf16>
    %cst = arith.constant dense<0.000000e+00> : vector<128x128xf32>
    %9 = tpu.matmul %8, %6, %cst {dimension_numbers = #tpu.dot_dimension_numbers<[1], [0], [0], [1], [0, 0, 1, 1], [], []>} : vector<128x256xbf16>, vector<256x128xbf16>, vector<128x128xf32> -> vector<128x128xf32>
    %10 = arith.addf %7, %9 : vector<128x128xf32>
    %c0_5 = arith.constant 0 : index
    %c0_6 = arith.constant 0 : index
    %11 = vector.load %arg7[%c0_5, %c0_6] : memref<128x128xf32, #tpu.memory_space<vmem>>, vector<128x128xf32>
    tpu.vector_store %arg7[%c0_5, %c0_6], %10 {strides = array<i32>} : memref<128x128xf32, #tpu.memory_space<vmem>>, vector<128x128xf32>,
    %c0_i32_7 = arith.constant 0 : i32
    %12 = arith.cmpi eq, %arg1, %c0_i32_7 : i32
    %13 = arith.extui %12 : i1 to i32
    %c0_i32_8 = arith.constant 0 : i32
    %14 = arith.cmpi ne, %13, %c0_i32_8 : i32
    scf.if %14 {
      %c0_9 = arith.constant 0 : index
      %c0_10 = arith.constant 0 : index
      %15 = vector.load %arg7[%c0_9, %c0_10] : memref<128x128xf32, #tpu.memory_space<vmem>>, vector<128x128xf32>
      %c0_11 = arith.constant 0 : index
      %c0_12 = arith.constant 0 : index
      %16 = vector.load %arg4[%c0_11, %c0_12] : memref<1x128xf32, #tpu.memory_space<vmem>>, vector<1x128xf32>
      %17 = vector.broadcast %16 : vector<1x128xf32> to vector<128x128xf32>
      %18 = arith.addf %15, %17 : vector<128x128xf32>
      %cst_13 = arith.constant 0.000000e+00 : f32
      %19 = vector.broadcast %cst_13 : f32 to vector<128x128xf32>
      %20 = arith.maximumf %18, %19 : vector<128x128xf32>
      %c0_14 = arith.constant 0 : index
      %c0_15 = arith.constant 0 : index
      %21 = vector.load %arg5[%c0_14, %c0_15] : memref<8x128xbf16, #tpu.memory_space<vmem>>, vector<8x128xbf16>
      %22 = arith.truncf %20 : vector<128x128xf32> to vector<128x128xbf16>
      %cst_16 = arith.constant dense<0.000000e+00> : vector<8x128xf32>
      %23 = tpu.matmul %21, %22, %cst_16 {dimension_numbers = #tpu.dot_dimension_numbers<[1], [0], [0], [1], [0, 0, 1, 1], [], []>} : vector<8x128xbf16>, vector<128x128xbf16>, vector<8x128xf32> -> vector<8x128xf32>
      %24 = vector.shape_cast %23 : vector<8x128xf32> to vector<1x8x128xf32>
      %c0_17 = arith.constant 0 : index
      %c0_18 = arith.constant 0 : index
      %c0_19 = arith.constant 0 : index
      %25 = vector.load %arg6[%c0_17, %c0_18, %c0_19] : memref<1x8x128xf32, #tpu.memory_space<vmem>>, vector<1x8x128xf32>
      tpu.vector_store %arg6[%c0_17, %c0_18, %c0_19], %24 {strides = array<i32>} : memref<1x8x128xf32, #tpu.memory_space<vmem>>, vector<1x8x128xf32>,
    } else {
    }
    return
  }
  func.func @transform_0(%arg0: i32, %arg1: i32) -> (i32, i32) {
    %c0_i32 = arith.constant 0 : i32
    return %arg0, %arg1 : i32, i32
  }
  func.func @transform_1(%arg0: i32, %arg1: i32) -> (i32, i32) {
    %c0_i32 = arith.constant 0 : i32
    %c0_i32_0 = arith.constant 0 : i32
    %c0_i32_1 = arith.constant 0 : i32
    return %c0_i32, %c0_i32_0 : i32, i32
  }
  func.func @transform_2(%arg0: i32, %arg1: i32) -> (i32, i32) {
    %c0_i32 = arith.constant 0 : i32
    %c0_i32_0 = arith.constant 0 : i32
    %c0_i32_1 = arith.constant 0 : i32
    return %c0_i32, %c0_i32_0 : i32, i32
  }
  func.func @transform_3(%arg0: i32, %arg1: i32) -> (i32, i32) {
    %c0_i32 = arith.constant 0 : i32
    %c0_i32_0 = arith.constant 0 : i32
    return %c0_i32, %arg0 : i32, i32
  }
  func.func @transform_4(%arg0: i32, %arg1: i32) -> (i32, i32, i32) {
    %c0_i32 = arith.constant 0 : i32
    %c0_i32_0 = arith.constant 0 : i32
    %c0_i32_1 = arith.constant 0 : i32
    return %arg0, %c0_i32, %c0_i32_0 : i32, i32, i32
  }
}

</mosaic_0001>

<bundles_post_ra>
// kernel: gcn_net_forward.2
= control target key start
LH: loop header
LB: loop body
LE: loop exit
PB: predicated region body
PF: predicated region fallthrough
CT: control target
= control target key end

     0   :  { %vm174_vm0 = vcmask 1043456   ;;  %vm125_vm1 = vcmask 64512   ;;  %s895_s1 = inlined_call_operand.vmem [shape: bf16[8,128], index: 1, kind: input, shape index: {}]   ;;  %s896_s0 = inlined_call_operand.vmem [shape: bf16[256,8], index: 0, kind: input, shape index: {}]   ;;  %s897_s2 = inlined_call_operand.vmem [shape: bf16[256,128], index: 2, kind: output, shape index: {}]  }
   0x1   :  { %v44_v0 = vld [vmem:[%s895_s1] sm:$0xf]  ;;  %v751_v4 = vld [vmem:[%s896_s0 + $0x8] sm:$0xff]   ;;  %v753_v6 = vld [vmem:[%s896_s0 + $0x10] sm:$0xff]  }
   0x2   :  { %747 = vmatprep.subr.msk.bf16.mxu0 %vm174_vm0, %v44_v0  ;;  %748 = vmatprep.subr.msk.bf16.mxu1 %vm174_vm0, %v44_v0  ;;  %v176_v1 = vsel %vm174_vm0, %v44_v0, 0  ;;  %v749_v2 = vld [vmem:[%s896_s0] sm:$0xff]   ;;  %v752_v5 = vld [vmem:[%s896_s0 + $0x48] sm:$0xff]   ;;  %v754_v7 = vld [vmem:[%s896_s0 + $0x50] sm:$0xff]  }
   0x3   :  { %712 = vmatpush3.bf16.msra.mxu0 %v176_v1  ;;  %746 = vmatpush3.bf16.msra.mxu1 %v176_v1  ;;  %v750_v3 = vld [vmem:[%s896_s0 + $0x40] sm:$0xff]   ;;  %v755_v8 = vld [vmem:[%s896_s0 + $0x18] sm:$0xff]   ;;  %v759_v12 = vld [vmem:[%s896_s0 + $0x28] sm:$0xff]  }
   0x4   :  { %713 = vmatprep.mubr.msk.bf16.mxu0 %vm125_vm1, %v749_v2  ;;  %729 = vmatprep.mubr.msk.bf16.mxu1 %vm125_vm1, %v750_v3  ;;  %v756_v9 = vld [vmem:[%s896_s0 + $0x58] sm:$0xff]   ;;  %v757_v10 = vld [vmem:[%s896_s0 + $0x20] sm:$0xff]   ;;  %v760_v13 = vld [vmem:[%s896_s0 + $0x68] sm:$0xff]  }
   0x5   :  { %v758_v11 = vld [vmem:[%s896_s0 + $0x60] sm:$0xff]   ;;  %v761_v14 = vld [vmem:[%s896_s0 + $0x30] sm:$0xff]   ;;  %v763_v16 = vld [vmem:[%s896_s0 + $0x38] sm:$0xff]  }
   0x6   :  { %714 = vmatmul.mubr.msk.bf16.vlgmr.msra.gmra.mrb[0].mxu0 %vm125_vm1, %v751_v4  ;;  %730 = vmatmul.mubr.msk.bf16.vlgmr.msra.gmra.mrb[0].mxu1 %vm125_vm1, %v752_v5  ;;  %v762_v15 = vld [vmem:[%s896_s0 + $0x70] sm:$0xff]   ;;  %v764_v17 = vld [vmem:[%s896_s0 + $0x78] sm:$0xff]  }
   0x7   :  { %717 = vmatprep.mubr.msk.bf16.mxu0 %vm125_vm1, %v753_v6  ;;  %733 = vmatprep.mubr.msk.bf16.mxu1 %vm125_vm1, %v754_v7 }
   0xe   :  { %718 = vmatmul.mubr.msk.bf16.gmra.mrb[4].mxu0 %vm125_vm1, %v755_v8  ;;  %734 = vmatmul.mubr.msk.bf16.gmra.mrb[4].mxu1 %vm125_vm1, %v756_v9 }
   0xf   :  { %721 = vmatprep.mubr.msk.bf16.mxu0 %vm125_vm1, %v757_v10  ;;  %737 = vmatprep.mubr.msk.bf16.mxu1 %vm125_vm1, %v758_v11 }
  0x16   :  { %722 = vmatmul.mubr.msk.bf16.gmra.mrb[8].mxu0 %vm125_vm1, %v759_v12  ;;  %738 = vmatmul.mubr.msk.bf16.gmra.mrb[8].mxu1 %vm125_vm1, %v760_v13 }
  0x17   :  { %725 = vmatprep.mubr.msk.bf16.mxu0 %vm125_vm1, %v761_v14  ;;  %741 = vmatprep.mubr.msk.bf16.mxu1 %vm125_vm1, %v762_v15 }
  0x1e   :  { %726 = vmatmul.mubr.msk.bf16.gmra.mrb[12].mxu0 %vm125_vm1, %v763_v16  ;;  %742 = vmatmul.mubr.msk.bf16.gmra.mrb[12].mxu1 %vm125_vm1, %v764_v17 }
  0xd9   :  { %v715_v18 = vpop.f32.mrb[0].mxu0  ;;  %v731_v19 = vpop.f32.mrb[0].mxu1 }
  0xda   :  { %v212_v20 = vpop.f32.mrb[1].mxu0  ;;  %v276_v21 = vpop.f32.mrb[1].mxu1 }
  0xdb   :  { %v716_v22 = vpop.f32.mrb[2].mxu0  ;;  %v732_v24 = vpop.f32.mrb[2].mxu1 }
  0xdc   :  { %v607_v23 = vpack.c.bf16 %v716_v22, %v715_v18  ;;  %v215_v25 = vpop.f32.mrb[3].mxu0  ;;  %v647_v26 = vpack.c.bf16 %v732_v24, %v731_v19  ;;  %v279_v28 = vpop.f32.mrb[3].mxu1 }
  0xdd   :  { %v602_v27 = vpack.c.bf16 %v215_v25, %v212_v20  ;;  %v642_v29 = vpack.c.bf16 %v279_v28, %v276_v21 }
  0xde   :  { %679 = vst [vmem:[%s897_s2 + $0x8] sm:$0xff] %v607_v23   ;;  %687 = vst [vmem:[%s897_s2 + $0x48] sm:$0xff] %v647_v26  }
  0xdf   :  { %603 = vst [vmem:[%s897_s2] sm:$0xff] %v602_v27   ;;  %686 = vst [vmem:[%s897_s2 + $0x40] sm:$0xff] %v642_v29  }
  0xe1   :  { %v719_v30 = vpop.f32.mrb[4].mxu0  ;;  %v735_v31 = vpop.f32.mrb[4].mxu1 }
  0xe2   :  { %v228_v32 = vpop.f32.mrb[5].mxu0  ;;  %v292_v33 = vpop.f32.mrb[5].mxu1 }
  0xe3   :  { %v720_v34 = vpop.f32.mrb[6].mxu0  ;;  %v736_v36 = vpop.f32.mrb[6].mxu1 }
  0xe4   :  { %v617_v35 = vpack.c.bf16 %v720_v34, %v719_v30  ;;  %v231_v37 = vpop.f32.mrb[7].mxu0  ;;  %v657_v38 = vpack.c.bf16 %v736_v36, %v735_v31  ;;  %v295_v40 = vpop.f32.mrb[7].mxu1 }
  0xe5   :  { %v612_v39 = vpack.c.bf16 %v231_v37, %v228_v32  ;;  %v652_v41 = vpack.c.bf16 %v295_v40, %v292_v33 }
  0xe6   :  { %681 = vst [vmem:[%s897_s2 + $0x18] sm:$0xff] %v617_v35   ;;  %689 = vst [vmem:[%s897_s2 + $0x58] sm:$0xff] %v657_v38  }
  0xe7   :  { %680 = vst [vmem:[%s897_s2 + $0x10] sm:$0xff] %v612_v39   ;;  %688 = vst [vmem:[%s897_s2 + $0x50] sm:$0xff] %v652_v41  }
  0xe9   :  { %v723_v42 = vpop.f32.mrb[8].mxu0  ;;  %v739_v43 = vpop.f32.mrb[8].mxu1 }
  0xea   :  { %v244_v44 = vpop.f32.mrb[9].mxu0  ;;  %v308_v45 = vpop.f32.mrb[9].mxu1 }
  0xeb   :  { %v724_v46 = vpop.f32.mrb[10].mxu0  ;;  %v740_v48 = vpop.f32.mrb[10].mxu1 }
  0xec   :  { %v627_v47 = vpack.c.bf16 %v724_v46, %v723_v42  ;;  %v247_v49 = vpop.f32.mrb[11].mxu0  ;;  %v667_v50 = vpack.c.bf16 %v740_v48, %v739_v43  ;;  %v311_v52 = vpop.f32.mrb[11].mxu1 }
  0xed   :  { %v622_v51 = vpack.c.bf16 %v247_v49, %v244_v44  ;;  %v662_v53 = vpack.c.bf16 %v311_v52, %v308_v45 }
  0xee   :  { %683 = vst [vmem:[%s897_s2 + $0x28] sm:$0xff] %v627_v47   ;;  %691 = vst [vmem:[%s897_s2 + $0x68] sm:$0xff] %v667_v50  }
  0xef   :  { %682 = vst [vmem:[%s897_s2 + $0x20] sm:$0xff] %v622_v51   ;;  %690 = vst [vmem:[%s897_s2 + $0x60] sm:$0xff] %v662_v53  }
  0xf1   :  { %v727_v54 = vpop.f32.mrb[12].mxu0  ;;  %v743_v55 = vpop.f32.mrb[12].mxu1 }
  0xf2   :  { %v260_v56 = vpop.f32.mrb[13].mxu0  ;;  %v324_v57 = vpop.f32.mrb[13].mxu1 }
  0xf3   :  { %v728_v58 = vpop.f32.mrb[14].mxu0  ;;  %v744_v60 = vpop.f32.mrb[14].mxu1 }
  0xf4   :  { %v637_v59 = vpack.c.bf16 %v728_v58, %v727_v54  ;;  %v263_v61 = vpop.f32.mrb[15].mxu0  ;;  %v677_v62 = vpack.c.bf16 %v744_v60, %v743_v55  ;;  %v327_v0 = vpop.f32.mrb[15].mxu1 }
  0xf5   :  { %v632_v63 = vpack.c.bf16 %v263_v61, %v260_v56  ;;  %v672_v1 = vpack.c.bf16 %v327_v0, %v324_v57 }
  0xf6   :  { %685 = vst [vmem:[%s897_s2 + $0x38] sm:$0xff] %v637_v59   ;;  %693 = vst [vmem:[%s897_s2 + $0x78] sm:$0xff] %v677_v62  }
  0xf7   :  { %684 = vst [vmem:[%s897_s2 + $0x30] sm:$0xff] %v632_v63   ;;  %692 = vst [vmem:[%s897_s2 + $0x70] sm:$0xff] %v672_v1  }

// kernel: gcn_net_forward.3
= control target key start
LH: loop header
LB: loop body
LE: loop exit
PB: predicated region body
PF: predicated region fallthrough
CT: control target
= control target key end

     0   :  { %s1086_s15 = smov 0   ;;  %s1088_s16 = smov 0   ;;  %s1223_s0 = inlined_call_operand.vmem [shape: bf16[256,256], index: 0, kind: input, shape index: {}]   ;;  %s1224_s1 = inlined_call_operand.vmem [shape: bf16[256,128], index: 1, kind: input, shape index: {}]   ;;  %s1225_s2 = inlined_call_operand.vmem [shape: f32[1,128], index: 2, kind: input, shape index: {}]   ;;  %s1226_s3 = inlined_call_operand.vmem [shape: bf16[8,256], index: 3, kind: input, shape index: {}]   ;;  %s1227_s4 = inlined_call_operand.vmem [shape: f32[2,8,128], index: 4, kind: output, shape index: {}]  }
   0x1   :  { %s1090_s17 = smov 0  }
   0x2 LB: > { %s26_s18 = sadd.s32 1, %s1053_s16  ;;  %p834_p0 = scmp.ge.s32.totalorder %s1057_s17, 1  ;;  %s1057_s17 = sphi %s1090_s17, %s14_s17   ;;  %s1053_s16 = sphi %s1088_s16, %s1229_s16   ;;  %s1049_s15 = sphi %s1086_s15, %s1228_s15  }
   0x3   : > { %p28_p1 = scmp.ge.s32.totalorder %s26_s18, 2  ;;  %p192_p2 = scmp.lt.s32.totalorder %s1057_s17, 3 }
   0x5   : > { %s1231_s18 = smov (%p28_p1, %s26_s18), 0  ;;  %p193_p3 = pnand %p834_p0, %p192_p2 }
   0x6   : > { %v995_v0 = vld [vmem:[%s1224_s1 + $0x40] sm:$0xff] (!%p193_p3)   ;;  %s835_s21 = sshll.u32 (!%p193_p3), %s1049_s15, 4  ;;  %v997_v2 = vld [vmem:[%s1224_s1 + $0x48] sm:$0xff] (!%p193_p3)   ;;  %v999_v4 = vld [vmem:[%s1224_s1 + $0x50] sm:$0xff] (!%p193_p3)   ;;  %v1059_v32 = vmov (!%p193_p3), 0.0   ;;  %vm1060_vm0 = vmmov (!%p193_p3), 0  }
   0x7   : > { %196 = sbr.rel (%p193_p3) target bundleno = 536 (0x218), region = 36  ;;  %v996_v1 = vld [vmem:[%s1224_s1] sm:$0xff] (!%p193_p3)   ;;  %876 = vmatprep.subr.bf16.mxu0 (!%p193_p3), %v995_v0  ;;  %v998_v3 = vld [vmem:[%s1224_s1 + $0x8] sm:$0xff] (!%p193_p3)   ;;  %p228_p4 = scmp.lt.s32.totalorder (!%p193_p3), %s835_s21, 31  ;;  %v1000_v5 = vld [vmem:[%s1224_s1 + $0x10] sm:$0xff] (!%p193_p3)   ;;  %949 = vmatprep.subr.bf16.mxu1 (!%p193_p3), %v1059_v32 }
   0x8   : > { %877 = vmatpush3.bf16.msra.mxu0 (!%p193_p3), %v996_v1  ;;  %v1001_v6 = vld [vmem:[%s1224_s1 + $0x58] sm:$0xff] (!%p193_p3)   ;;  %v1003_v8 = vld [vmem:[%s1224_s1 + $0x60] sm:$0xff] (!%p193_p3)   ;;  %v1005_v10 = vld [vmem:[%s1224_s1 + $0x68] sm:$0xff] (!%p193_p3)   ;;  %965 = vmatprep.mubr.msk.bf16.mxu1 (!%p193_p3), %vm1060_vm0, %v1059_v32  ;;  %p238_p5 = scmp.lt.s32.totalorder (!%p193_p3), %s1049_s15, 1 }
   0x9   : > { %878 = vmatprep.subr.bf16.mxu0 (!%p193_p3), %v997_v2  ;;  %v1002_v7 = vld [vmem:[%s1224_s1 + $0x18] sm:$0xff] (!%p193_p3)   ;;  %v1004_v9 = vld [vmem:[%s1224_s1 + $0x20] sm:$0xff] (!%p193_p3)   ;;  %v1006_v12 = vld [vmem:[%s1224_s1 + $0x28] sm:$0xff] (!%p193_p3)  }
   0xa   : > { %v1007_v13 = vld [vmem:[%s1224_s1 + $0x70] sm:$0xff] (!%p193_p3)   ;;  %v1009_v15 = vld [vmem:[%s1224_s1 + $0x78] sm:$0xff] (!%p193_p3)   ;;  %v1181_v35 = vld [vmem:[%s1225_s2] ss:$0 sm:$0xff] (!%p193_p3) }
   0xb   : > { %v1008_v14 = vld [vmem:[%s1224_s1 + $0x30] sm:$0xff] (!%p193_p3)   ;;  %v1010_v16 = vld [vmem:[%s1224_s1 + $0x38] sm:$0xff] (!%p193_p3)  }
   0xc   : > { %879 = vmatpush3.bf16.msra.mxu0 (!%p193_p3), %v998_v3 }
   0xd   : > { %880 = vmatprep.subr.bf16.mxu0 (!%p193_p3), %v999_v4 }
   0xe   : > { %s1233_s21 = smov (!%p228_p4, %s835_s21), 31  ;;  %s1235_s15 = smov (!%p238_p5, %s1049_s15), 1 }
   0xf   : > { %s875_s10 = sshll.u32 %s1233_s21, 3  ;;  %s839_s14 = sshll.u32 %s1235_s15, 3 }
  0x10   : > { %881 = vmatpush3.bf16.msra.mxu0 %v1000_v5  ;;  %s1137_s19 = scalar_lea.vmem %s1223_s0, %s875_s10  ;;  %s838_s10 = sshll.u32 %s1235_s15, 2 }
  0x11   : > { %882 = vmatprep.subr.bf16.mxu0 %v1001_v6  ;;  %v1013_v11 = vld [vmem:[%s1137_s19 + $0x4] ss:$8 sps:$4 sm:$0xff]   ;;  %v1011_v17 = vld [vmem:[%s1137_s19] ss:$8 sps:$4 sm:$0xff]   ;;  %v1014_v18 = vld [vmem:[%s1137_s19 + $0x14] ss:$8 sps:$4 sm:$0xff]   ;;  %s241_s13 = scalar_lea.vmem %s1226_s3, %s838_s10  ;;  %s245_s22 = scalar_lea.vmem %s1227_s4, %s839_s14 }
  0x12   : > { %544 = vmatprep.mubr.bf16.mxu0 %v1013_v11  ;;  %v1016_v19 = vld [vmem:[%s1137_s19 + $0x10] ss:$8 sps:$4 sm:$0xff]   ;;  %v1017_v20 = vld [vmem:[%s1137_s19 + $0x24] ss:$8 sps:$4 sm:$0xff]   ;;  %v1019_v21 = vld [vmem:[%s1137_s19 + $0x20] ss:$8 sps:$4 sm:$0xff]  }
  0x13   : > { %v1020_v22 = vld [vmem:[%s1137_s19 + $0x34] ss:$8 sps:$4 sm:$0xff]   ;;  %v1022_v23 = vld [vmem:[%s1137_s19 + $0x30] ss:$8 sps:$4 sm:$0xff]   ;;  %v1023_v24 = vld [vmem:[%s1137_s19 + $0x44] ss:$8 sps:$4 sm:$0xff]  }
  0x14   : > { %883 = vmatpush3.bf16.msra.mxu0 %v1002_v7  ;;  %v1025_v25 = vld [vmem:[%s1137_s19 + $0x40] ss:$8 sps:$4 sm:$0xff]   ;;  %v1026_v26 = vld [vmem:[%s1137_s19 + $0x54] ss:$8 sps:$4 sm:$0xff]   ;;  %v1028_v27 = vld [vmem:[%s1137_s19 + $0x50] ss:$8 sps:$4 sm:$0xff]  }
  0x15   : > { %884 = vmatprep.subr.bf16.mxu0 %v1003_v8  ;;  %v1029_v28 = vld [vmem:[%s1137_s19 + $0x64] ss:$8 sps:$4 sm:$0xff]   ;;  %v1031_v29 = vld [vmem:[%s1137_s19 + $0x60] ss:$8 sps:$4 sm:$0xff]   ;;  %v1032_v30 = vld [vmem:[%s1137_s19 + $0x74] ss:$8 sps:$4 sm:$0xff]  }
  0x16   : > { %v1034_v31 = vld [vmem:[%s1137_s19 + $0x70] ss:$8 sps:$4 sm:$0xff]  }
  0x18   : > { %885 = vmatpush3.bf16.msra.mxu0 %v1004_v9 }
  0x19   : > { %886 = vmatprep.subr.bf16.mxu0 %v1005_v10 }
  0x1c   : > { %887 = vmatpush3.bf16.msra.mxu0 %v1006_v12 }
  0x1d   : > { %888 = vmatprep.subr.bf16.mxu0 %v1007_v13 }
  0x20   : > { %889 = vmatpush3.bf16.msra.mxu0 %v1008_v14 }
  0x21   : > { %890 = vmatprep.subr.bf16.mxu0 %v1009_v15 }
  0x24   : > { %891 = vmatpush3.bf16.msra.mxu0 %v1010_v16 }
  0x27   : > { %545 = vmatmul.mubr.bf16.vlgmr.msra.gmra.mrb[0].mxu0 %v1011_v17 }
  0x28   : > { %552 = vmatprep.mubr.bf16.mxu0 %v1014_v18 }
  0x2f   : > { %553 = vmatmul.mubr.bf16.gmra.mrb[4].mxu0 %v1016_v19 }
  0x30   : > { %560 = vmatprep.mubr.bf16.mxu0 %v1017_v20 }
  0x37   : > { %561 = vmatmul.mubr.bf16.gmra.mrb[8].mxu0 %v1019_v21 }
  0x38   : > { %568 = vmatprep.mubr.bf16.mxu0 %v1020_v22 }
  0x3f   : > { %569 = vmatmul.mubr.bf16.gmra.mrb[12].mxu0 %v1022_v23 }
  0x40   : > { %576 = vmatprep.mubr.bf16.mxu0 %v1023_v24 }
  0x47   : > { %577 = vmatmul.mubr.bf16.gmra.mrb[16].mxu0 %v1025_v25 }
  0x48   : > { %584 = vmatprep.mubr.bf16.mxu0 %v1026_v26 }
  0x4f   : > { %585 = vmatmul.mubr.bf16.gmra.mrb[20].mxu0 %v1028_v27 }
  0x50   : > { %592 = vmatprep.mubr.bf16.mxu0 %v1029_v28 }
  0x57   : > { %593 = vmatmul.mubr.bf16.gmra.mrb[24].mxu0 %v1031_v29 }
  0x58   : > { %600 = vmatprep.mubr.bf16.mxu0 %v1032_v30 }
  0x5f   : > { %601 = vmatmul.mubr.bf16.gmra.mrb[28].mxu0 %v1034_v31 }
  0xfa   : > { %v892_v33 = vpop.f32.mrb[0].mxu0 }
  0xfb   : > { %v893_v34 = vpop.f32.mrb[1].mxu0 }
  0xfc   : > { %v894_v36 = vadd.f32 %v893_v34, %v892_v33  ;;  %v895_v37 = vpop.f32.mrb[2].mxu0 }
  0xfd   : > { %v896_v38 = vpop.f32.mrb[3].mxu0 }
  0xfe   : > { %v667_v39 = vadd.f32 %v894_v36, %v1181_v35  ;;  %v897_v40 = vadd.f32 %v896_v38, %v895_v37 }
 0x100   : > { %v668_v41 = vadd.f32 %v897_v40, %v1181_v35  ;;  %v683_v42 = vmax.f32 %v667_v39, 0.0 }
 0x102   : > { %v684_v43 = vmax.f32 %v668_v41, 0.0  ;;  %v898_v44 = vpop.f32.mrb[4].mxu0 }
 0x103   : > { %v899_v45 = vpop.f32.mrb[5].mxu0 }
 0x104   : > { %v900_v46 = vadd.f32 %v899_v45, %v898_v44  ;;  %v901_v47 = vpop.f32.mrb[6].mxu0  ;;  %v700_v48 = vpack.c.bf16 %v684_v43, %v683_v42 }
 0x105   : > { %v902_v49 = vpop.f32.mrb[7].mxu0 }
 0x106   : > { %v669_v50 = vadd.f32 %v900_v46, %v1181_v35  ;;  %v903_v51 = vadd.f32 %v902_v49, %v901_v47  ;;  %950 = vmatpush3.bf16.msra.mxu1 %v700_v48 }
 0x107   : > { %951 = vmatprep.subr.bf16.mxu1 %v1059_v32 }
 0x108   : > { %v670_v52 = vadd.f32 %v903_v51, %v1181_v35  ;;  %v685_v53 = vmax.f32 %v669_v50, 0.0 }
 0x10a   : > { %v686_v54 = vmax.f32 %v670_v52, 0.0  ;;  %v904_v55 = vpop.f32.mrb[8].mxu0 }
 0x10b   : > { %v905_v56 = vpop.f32.mrb[9].mxu0 }
 0x10c   : > { %v906_v57 = vadd.f32 %v905_v56, %v904_v55  ;;  %v907_v58 = vpop.f32.mrb[10].mxu0  ;;  %v701_v59 = vpack.c.bf16 %v686_v54, %v685_v53 }
 0x10d   : > { %v908_v60 = vpop.f32.mrb[11].mxu0 }
 0x10e   : > { %v671_v61 = vadd.f32 %v906_v57, %v1181_v35  ;;  %v909_v62 = vadd.f32 %v908_v60, %v907_v58  ;;  %952 = vmatpush3.bf16.msra.mxu1 %v701_v59  ;;  %v699_v60 = vld [vmem:[%s241_s13] sm:$0xf] }
 0x10f   : > { %953 = vmatprep.subr.bf16.mxu1 %v1059_v32 }
 0x110   : > { %v672_v63 = vadd.f32 %v909_v62, %v1181_v35  ;;  %v687_v0 = vmax.f32 %v671_v61, 0.0 }
 0x112   : > { %v688_v1 = vmax.f32 %v672_v63, 0.0  ;;  %v910_v2 = vpop.f32.mrb[12].mxu0 }
 0x113   : > { %v911_v3 = vpop.f32.mrb[13].mxu0 }
 0x114   : > { %v912_v4 = vadd.f32 %v911_v3, %v910_v2  ;;  %v913_v5 = vpop.f32.mrb[14].mxu0  ;;  %v702_v6 = vpack.c.bf16 %v688_v1, %v687_v0 }
 0x115   : > { %v914_v7 = vpop.f32.mrb[15].mxu0 }
 0x116   : > { %v673_v8 = vadd.f32 %v912_v4, %v1181_v35  ;;  %v915_v9 = vadd.f32 %v914_v7, %v913_v5  ;;  %954 = vmatpush3.bf16.msra.mxu1 %v702_v6 }
 0x117   : > { %955 = vmatprep.subr.bf16.mxu1 %v1059_v32 }
 0x118   : > { %v674_v10 = vadd.f32 %v915_v9, %v1181_v35  ;;  %v689_v11 = vmax.f32 %v673_v8, 0.0 }
 0x11a   : > { %v690_v12 = vmax.f32 %v674_v10, 0.0  ;;  %v916_v13 = vpop.f32.mrb[16].mxu0 }
 0x11b   : > { %v917_v14 = vpop.f32.mrb[17].mxu0 }
 0x11c   : > { %v918_v15 = vadd.f32 %v917_v14, %v916_v13  ;;  %v919_v16 = vpop.f32.mrb[18].mxu0  ;;  %v703_v17 = vpack.c.bf16 %v690_v12, %v689_v11 }
 0x11d   : > { %v920_v18 = vpop.f32.mrb[19].mxu0 }
 0x11e   : > { %v675_v19 = vadd.f32 %v918_v15, %v1181_v35  ;;  %v921_v20 = vadd.f32 %v920_v18, %v919_v16  ;;  %956 = vmatpush3.bf16.msra.mxu1 %v703_v17 }
 0x11f   : > { %957 = vmatprep.subr.bf16.mxu1 %v1059_v32 }
 0x120   : > { %v676_v21 = vadd.f32 %v921_v20, %v1181_v35  ;;  %v691_v22 = vmax.f32 %v675_v19, 0.0 }
 0x122   : > { %v692_v23 = vmax.f32 %v676_v21, 0.0  ;;  %v922_v24 = vpop.f32.mrb[20].mxu0 }
 0x123   : > { %v923_v25 = vpop.f32.mrb[21].mxu0 }
 0x124   : > { %v924_v26 = vadd.f32 %v923_v25, %v922_v24  ;;  %v925_v27 = vpop.f32.mrb[22].mxu0  ;;  %v704_v28 = vpack.c.bf16 %v692_v23, %v691_v22 }
 0x125   : > { %v926_v29 = vpop.f32.mrb[23].mxu0 }
 0x126   : > { %v677_v30 = vadd.f32 %v924_v26, %v1181_v35  ;;  %v927_v31 = vadd.f32 %v926_v29, %v925_v27  ;;  %958 = vmatpush3.bf16.msra.mxu1 %v704_v28 }
 0x127   : > { %959 = vmatprep.subr.bf16.mxu1 %v1059_v32 }
 0x128   : > { %v678_v33 = vadd.f32 %v927_v31, %v1181_v35  ;;  %v693_v34 = vmax.f32 %v677_v30, 0.0 }
 0x12a   : > { %v694_v36 = vmax.f32 %v678_v33, 0.0  ;;  %v928_v37 = vpop.f32.mrb[24].mxu0 }
 0x12b   : > { %v929_v38 = vpop.f32.mrb[25].mxu0 }
 0x12c   : > { %v930_v39 = vadd.f32 %v929_v38, %v928_v37  ;;  %v931_v40 = vpop.f32.mrb[26].mxu0  ;;  %v705_v41 = vpack.c.bf16 %v694_v36, %v693_v34 }
 0x12d   : > { %v932_v42 = vpop.f32.mrb[27].mxu0 }
 0x12e   : > { %v679_v43 = vadd.f32 %v930_v39, %v1181_v35  ;;  %v933_v44 = vadd.f32 %v932_v42, %v931_v40  ;;  %960 = vmatpush3.bf16.msra.mxu1 %v705_v41 }
 0x12f   : > { %961 = vmatprep.subr.bf16.mxu1 %v1059_v32 }
 0x130   : > { %v680_v45 = vadd.f32 %v933_v44, %v1181_v35  ;;  %v695_v46 = vmax.f32 %v679_v43, 0.0 }
 0x132   : > { %v696_v47 = vmax.f32 %v680_v45, 0.0  ;;  %v934_v48 = vpop.f32.mrb[28].mxu0 }
 0x133   : > { %v935_v49 = vpop.f32.mrb[29].mxu0 }
 0x134   : > { %v936_v50 = vadd.f32 %v935_v49, %v934_v48  ;;  %v937_v51 = vpop.f32.mrb[30].mxu0  ;;  %v706_v52 = vpack.c.bf16 %v696_v47, %v695_v46 }
 0x135   : > { %v938_v53 = vpop.f32.mrb[31].mxu0 }
 0x136   : > { %v681_v54 = vadd.f32 %v936_v50, %v1181_v35  ;;  %v939_v55 = vadd.f32 %v938_v53, %v937_v51  ;;  %962 = vmatpush3.bf16.msra.mxu1 %v706_v52 }
 0x137   : > { %963 = vmatprep.subr.bf16.mxu1 %v1059_v32 }
 0x138   : > { %v682_v56 = vadd.f32 %v939_v55, %v1181_v35  ;;  %v697_v57 = vmax.f32 %v681_v54, 0.0 }
 0x13a   : > { %v698_v58 = vmax.f32 %v682_v56, 0.0 }
 0x13c   : > { %v707_v59 = vpack.c.bf16 %v698_v58, %v697_v57 }
 0x13e   : > { %964 = vmatpush3.bf16.msra.mxu1 %v707_v59 }
 0x141   : > { %966 = vmatmul.mubr.bf16.vlgmr.msra.gmra.mrb[0].mxu1 %v699_v60 }
 0x214   : > { %v742_v61 = vpop.f32.mrb[0].mxu1 }
 0x215   : > { %748 = vst [vmem:[%s245_s22] sm:$0xff] %v742_v61  ;;  %v967_v32 = vpop.f32.mrb[1].mxu1 }
 0x216   : > { %v745_v35 = vpop.f32.mrb[2].mxu1 }
 0x217   : > { %v968_v62 = vpop.f32.mrb[3].mxu1 }
 0x218 PF: > { %s14_s17 = sadd.s32 1, %s1057_s17   ;;  %s1228_s15 = smov %s1053_s16 }
 0x219   : > { %p11_p6 = scmp.ge.s32.totalorder %s14_s17, 4   ;;  %s1229_s16 = smov %s1231_s18 }
 0x21b   :  { %13 = sbr.rel (!%p11_p6) target bundleno = 2 (0x2), region = 78 }

</bundles_post_ra>
